<compile_context>
chip_gen: v7x
topology: tpu7x:2x2x1
jax: 0.10.0
libtpu: 0.0.40
codegen_flags: <defaults>
</compile_context>

<pallas_src>
import functools

import jax
import jax.numpy as jnp
from jax import lax
from jax.experimental import pallas as pl
from jax.experimental.pallas import tpu as pltpu


NEG_BIG = 1e8          # diagonal suppression (matches the module's 1e8 * I)
LEAKY_SLOPE = 0.01     # PyTorch F.leaky_relu default negative slope


# ---------------------------------------------------------------------------
# Kernel 1: whole (N, N) adjacency per step, several batches packed per step.
# ---------------------------------------------------------------------------
def _dot_graph_kernel(x_ref, wt_ref, b_ref, out_ref, *, flatten_out):
    # x_ref:  (Bb, N, D)   packed batch slab of node features
    # wt_ref: (D, D)       transposed linear weight (h = x @ wt + b)
    # b_ref:  (1, D)       linear bias
    # out_ref:(Bb, 1, N*N) if flatten_out else (Bb, N, N)
    bb, n, d = x_ref.shape

    # Linear map.  Flattening the leading dims is only layout-free when N is
    # sublane-aligned; otherwise do a batched contraction directly.
    if n % 8 == 0:
        x2 = x_ref[...].reshape(bb * n, d)
        h = (jnp.dot(x2, wt_ref[...], preferred_element_type=jnp.float32)
             + b_ref[...]).reshape(bb, n, d)
    else:
        h = lax.dot_general(x_ref[...], wt_ref[...],
                            dimension_numbers=(((2,), (0,)), ((), ())),
                            preferred_element_type=jnp.float32) + b_ref[...]

    # Batched gram matrix, contracting the LAST dim of both operands
    # (batch=(0,0), contract=(2,2)) -> no transpose through the XLU.
    adj = jnp.einsum("bnd,bmd->bnm", h, h,
                     preferred_element_type=jnp.float32)          # (Bb, N, N)

    # Single 2-D f32 diagonal mask, used additively (no i32 (Bb,N,N) iotas,
    # no selects).
    diag = (lax.broadcasted_iota(jnp.int32, (n, n), 0)
            == lax.broadcasted_iota(jnp.int32, (n, n), 1)).astype(jnp.float32)

    # leaky_relu first, then fold the -1e8 onto the diagonal: identical after
    # softmax (the diagonal is driven to exp(-huge) == 0 either way), one
    # fewer full-tensor VPU pass.
    leaky = jnp.maximum(adj, LEAKY_SLOPE * adj)
    masked = leaky - NEG_BIG * diag

    # Row-wise numerically stable softmax with an EXACT normalization.
    m = jnp.max(masked, axis=-1, keepdims=True)
    e = jnp.exp(masked - m)
    s = jnp.sum(e, axis=-1, keepdims=True)
    soft = e / s

    result = soft + diag                                          # "+ I"

    if flatten_out:
        # Lane-dense store: (Bb, 1, N*N) slab -> unmasked full-width vst.
        out_ref[...] = result.reshape(bb, 1, n * n).astype(out_ref.dtype)
    else:
        out_ref[...] = result.astype(out_ref.dtype)


# ---------------------------------------------------------------------------
# Kernel 2: row-tiled variant for large N (h cached in VMEM scratch).
# ---------------------------------------------------------------------------
def _dot_graph_rowtiled_kernel(x_ref, wt_ref, b_ref, out_ref, h_scr):
    # x_ref:  (1, N, D)  current batch
    # out_ref:(1, tm, N) row tile of the adjacency
    # h_scr:  (N, D)     VMEM scratch holding the mapped features of the batch
    _, n, d = x_ref.shape
    tm = out_ref.shape[1]
    rt = pl.program_id(1)

    @pl.when(rt == 0)
    def _():
        h_scr[...] = (jnp.dot(x_ref[0], wt_ref[...],
                              preferred_element_type=jnp.float32) + b_ref[...])

    r0 = pl.multiple_of(rt * tm, 8)
    h_rows = h_scr[pl.ds(r0, tm), :]                               # (tm, D)

    # (tm, D) x (N, D) contracted on the last dims -> (tm, N); no transpose.
    adj = lax.dot_general(h_rows, h_scr[...],
                          dimension_numbers=(((1,), (1,)), ((), ())),
                          preferred_element_type=jnp.float32)

    row_g = rt * tm + lax.broadcasted_iota(jnp.int32, (tm, n), 0)
    col = lax.broadcasted_iota(jnp.int32, (tm, n), 1)
    diag = (row_g == col).astype(jnp.float32)

    leaky = jnp.maximum(adj, LEAKY_SLOPE * adj)
    masked = leaky - NEG_BIG * diag

    m = jnp.max(masked, axis=-1, keepdims=True)
    e = jnp.exp(masked - m)
    s = jnp.sum(e, axis=-1, keepdims=True)
    soft = e / s

    out_ref[0] = (soft + diag).astype(out_ref.dtype)


# ---------------------------------------------------------------------------
# Footprint / budget helpers (generation aware).
# ---------------------------------------------------------------------------
def _vmem_capacity_bytes():
    try:
        return int(pltpu.get_tpu_info().vmem_capacity_bytes)
    except Exception:
        return 64 * 1024 * 1024   # conservative (v7x-sized) fallback


def _step_bytes(bb, n, d):
    f32 = 4
    return f32 * (2 * bb * n * d        # x block (double-buffered)
                  + 2 * bb * n * n      # out block (double-buffered)
                  + 2 * d * d + d       # weight (double-buffered) + bias
                  + 2 * bb * n * d      # h + linear temporaries
                  + 5 * bb * n * n)     # adj/leaky/exp/soft temporaries


def _rowtile_step_bytes(tm, n, d):
    f32 = 4
    return f32 * (2 * n * d             # x block (double-buffered)
                  + 2 * tm * n          # out tile (double-buffered)
                  + n * d               # h scratch
                  + 2 * d * d + d
                  + 5 * tm * n + tm * d)


def _pick_batch_block(bs, n, d, budget):
    # Largest divisor of bs whose per-step footprint fits the budget, while
    # keeping >= 2 grid steps (when possible) so the "parallel" batch axis can
    # be split across v7x's two TensorCores.
    max_bb = bs // 2 if bs >= 2 else 1
    best = 1
    for bb in range(1, max_bb + 1):
        if bs % bb == 0 and _step_bytes(bb, n, d) <= budget:
            best = bb
    return best


# ---------------------------------------------------------------------------
# Public wrapper.
# ---------------------------------------------------------------------------
def dot_graph_construction(node_features, weight, bias, *, batch_block=None,
                           row_block=None, out_dtype=jnp.float32):
    """node_features: (bs, N, D); weight: (D, D) PyTorch layout (out, in); bias: (D,).

    out_dtype may be jnp.bfloat16 for callers that tolerate it (halves the
    HBM writeback on the mem-bound shapes).
    """
    bs, N, D = node_features.shape
    wt = weight.T                       # glue: kernel computes x @ wt + b
    b2 = bias.reshape(1, D)             # glue: 2-D bias

    capacity = _vmem_capacity_bytes()
    budget = int(capacity * 0.4)        # block-picking budget (headroom)
    limit_cap = int(capacity * 0.8)     # never exceed 0.8x physical VMEM

    # Decide whether we need the row-tiled path (explicit request, or a single
    # (1, N, N) block would not fit the VMEM budget).
    use_row_tiling = row_block is not None
    if not use_row_tiling and _step_bytes(1, N, D) > budget and N % 8 == 0:
        divisors = [t for t in range(8, N, 8) if N % t == 0]
        fitting = [t for t in divisors if _rowtile_step_bytes(t, N, D) <= budget]
        if fitting:
            row_block = fitting[-1]
            use_row_tiling = True
        elif divisors:
            row_block = divisors[0]
            use_row_tiling = True

    if use_row_tiling:
        assert N % row_block == 0 and row_block % 8 == 0, (
            "row_block must be a multiple of 8 that divides N")
        step = _rowtile_step_bytes(row_block, N, D)
        vmem_limit = int(min(max(2 * step, 16 * 1024 * 1024), limit_cap))
        return pl.pallas_call(
            _dot_graph_rowtiled_kernel,
            out_shape=jax.ShapeDtypeStruct((bs, N, N), out_dtype),
            grid_spec=pltpu.PrefetchScalarGridSpec(
                num_scalar_prefetch=0,
                grid=(bs, N // row_block),
                in_specs=[
                    pl.BlockSpec((1, N, D), lambda b, r: (b, 0, 0)),
                    pl.BlockSpec((D, D), lambda b, r: (0, 0)),
                    pl.BlockSpec((1, D), lambda b, r: (0, 0)),
                ],
                out_specs=pl.BlockSpec((1, row_block, N), lambda b, r: (b, r, 0)),
                scratch_shapes=[pltpu.VMEM((N, D), jnp.float32)],
            ),
            compiler_params=pltpu.CompilerParams(
                dimension_semantics=("parallel", "arbitrary"),
                vmem_limit_bytes=vmem_limit),
        )(node_features, wt, b2)

    # --- whole-(N,N)-block path ---
    if batch_block is None:
        batch_block = _pick_batch_block(bs, N, D, budget)
    assert bs % batch_block == 0

    step = _step_bytes(batch_block, N, D)
    vmem_limit = int(min(max(2 * step, 16 * 1024 * 1024), limit_cap))

    flatten_out = (N % 128) != 0        # lane-dense output for small/unaligned N
    if flatten_out:
        out_shape = jax.ShapeDtypeStruct((bs, 1, N * N), out_dtype)
        out_spec = pl.BlockSpec((batch_block, 1, N * N), lambda b: (b, 0, 0))
    else:
        out_shape = jax.ShapeDtypeStruct((bs, N, N), out_dtype)
        out_spec = pl.BlockSpec((batch_block, N, N), lambda b: (b, 0, 0))

    out = pl.pallas_call(
        functools.partial(_dot_graph_kernel, flatten_out=flatten_out),
        out_shape=out_shape,
        grid_spec=pltpu.PrefetchScalarGridSpec(
            num_scalar_prefetch=0,
            grid=(bs // batch_block,),
            in_specs=[
                pl.BlockSpec((batch_block, N, D), lambda b: (b, 0, 0)),
                pl.BlockSpec((D, D), lambda b: (0, 0)),
                pl.BlockSpec((1, D), lambda b: (0, 0)),
            ],
            out_specs=out_spec,
        ),
        compiler_params=pltpu.CompilerParams(
            dimension_semantics=("parallel",),
            vmem_limit_bytes=vmem_limit),
    )(node_features, wt, b2)

    if flatten_out:
        out = out.reshape(bs, N, N)     # contiguous HBM reshape, free
    return out


# ---------------------------------------------------------------------------
# Reference + self-test.
# ---------------------------------------------------------------------------
def _reference(node_features, weight, bias):
    hi = jax.lax.Precision.HIGHEST
    h = jnp.einsum("bnd,kd->bnk", node_features, weight, precision=hi) + bias
    adj = jnp.einsum("bnd,bmd->bnm", h, h, precision=hi)
    n = h.shape[1]
    eye = jnp.eye(n, dtype=jnp.float32)
    adj = adj - eye * NEG_BIG
    adj = jnp.where(adj >= 0.0, adj, LEAKY_SLOPE * adj)
    adj = jax.nn.softmax(adj, axis=-1)
    return adj + eye


if __name__ == "__main__":
    key = jax.random.PRNGKey(0)
    bs, N, D = 2, 16, 32

    kx, kw, kb = jax.random.split(key, 3)
    node_features = jax.random.normal(kx, (bs, N, D), dtype=jnp.float32)

    # Deterministic Linear(input_dim, input_dim) params (kaiming-uniform-ish bound)
    bound = 1.0 / (D ** 0.5)
    weight = jax.random.uniform(kw, (D, D), minval=-bound, maxval=bound,
                                dtype=jnp.float32)
    bias = jax.random.uniform(kb, (D,), minval=-bound, maxval=bound,
                              dtype=jnp.float32)

    ref = _reference(node_features, weight, bias)

    # Default path: whole-block kernel with lane-dense flattened output.
    out = jax.block_until_ready(dot_graph_construction(node_features, weight, bias))
    assert out.shape == (bs, N, N)
    # Tolerance covers MXU matmul-pass differences between the XLA reference
    # and the in-kernel f32 matmuls across TPU generations / interpret mode.
    assert jnp.allclose(out, ref, atol=2e-2, rtol=2e-2), "mismatch vs reference"

    # Row-tiled path (auto-selected for large N); validated here at row_block=8.
    out_rt = jax.block_until_ready(
        dot_graph_construction(node_features, weight, bias, row_block=8))
    assert out_rt.shape == (bs, N, N)
    assert jnp.allclose(out_rt, ref, atol=2e-2, rtol=2e-2), "row-tiled mismatch"

    print("KERNEL_OK")
</pallas_src>

<mosaic_0001>
module attributes {stable_mosaic.version = 11 : i64} {
  func.func @_dot_graph_kernel(%arg0: i32, %arg1: memref<1x16x32xf32, #tpu.memory_space<vmem>>, %arg2: memref<32x32xf32, #tpu.memory_space<vmem>>, %arg3: memref<1x32xf32, #tpu.memory_space<vmem>>, %arg4: memref<1x1x256xf32, #tpu.memory_space<vmem>>) attributes {dimension_semantics = [#tpu.dimension_semantics<parallel>], iteration_bounds = array<i64: 2>, scalar_prefetch = 0 : i64, scratch_operands = 0 : i64, tpu.core_type = #tpu.core_type<tc>, window_params = [{transform_indices = @transform_0, window_bounds = array<i64: 1, 16, 32>}, {pipeline_mode = #tpu.pipeline_mode<synchronous>, transform_indices = @transform_1, window_bounds = array<i64: 32, 32>}, {pipeline_mode = #tpu.pipeline_mode<synchronous>, transform_indices = @transform_2, window_bounds = array<i64: 1, 32>}, {transform_indices = @transform_3, window_bounds = array<i64: 1, 1, 256>}]} {
    %c0 = arith.constant 0 : index
    %c0_0 = arith.constant 0 : index
    %c0_1 = arith.constant 0 : index
    %0 = vector.load %arg1[%c0, %c0_0, %c0_1] : memref<1x16x32xf32, #tpu.memory_space<vmem>>, vector<1x16x32xf32>
    %1 = vector.shape_cast %0 : vector<1x16x32xf32> to vector<16x32xf32>
    %c0_2 = arith.constant 0 : index
    %c0_3 = arith.constant 0 : index
    %2 = vector.load %arg2[%c0_2, %c0_3] : memref<32x32xf32, #tpu.memory_space<vmem>>, vector<32x32xf32>
    %cst = arith.constant dense<0.000000e+00> : vector<16x32xf32>
    %3 = tpu.matmul %1, %2, %cst {dimension_numbers = #tpu.dot_dimension_numbers<[1], [0], [0], [1], [0, 0, 1, 1], [], []>} : vector<16x32xf32>, vector<32x32xf32>, vector<16x32xf32> -> vector<16x32xf32>
    %c0_4 = arith.constant 0 : index
    %c0_5 = arith.constant 0 : index
    %4 = vector.load %arg3[%c0_4, %c0_5] : memref<1x32xf32, #tpu.memory_space<vmem>>, vector<1x32xf32>
    %5 = vector.broadcast %4 : vector<1x32xf32> to vector<16x32xf32>
    %6 = arith.addf %3, %5 : vector<16x32xf32>
    %7 = vector.shape_cast %6 : vector<16x32xf32> to vector<1x16x32xf32>
    "tpu.trace_start"() <{level = 10 : i32, message = "bnd,bmd->bnm"}> : () -> ()
    %cst_6 = arith.constant dense<0.000000e+00> : vector<1x16x16xf32>
    %8 = tpu.matmul %7, %7, %cst_6 {dimension_numbers = #tpu.dot_dimension_numbers<[2], [2], [1], [1], [0, 0, 0, 1, 1, 1], [0], [0]>} : vector<1x16x32xf32>, vector<1x16x32xf32>, vector<1x16x16xf32> -> vector<1x16x16xf32>
    "tpu.trace_stop"() : () -> ()
    %9 = tpu.iota {dimensions = array<i32: 0>} : vector<16x16xi32>
    %10 = tpu.iota {dimensions = array<i32: 1>} : vector<16x16xi32>
    %11 = arith.cmpi eq, %9, %10 : vector<16x16xi32>
    %12 = arith.extui %11 : vector<16x16xi1> to vector<16x16xi32>
    %13 = arith.sitofp %12 : vector<16x16xi32> to vector<16x16xf32>
    %cst_7 = arith.constant 0.00999999977 : f32
    %14 = vector.broadcast %cst_7 : f32 to vector<1x16x16xf32>
    %15 = arith.mulf %14, %8 : vector<1x16x16xf32>
    %16 = arith.maximumf %8, %15 : vector<1x16x16xf32>
    %cst_8 = arith.constant 1.000000e+08 : f32
    %17 = vector.broadcast %cst_8 : f32 to vector<16x16xf32>
    %18 = arith.mulf %17, %13 : vector<16x16xf32>
    %19 = vector.shape_cast %18 : vector<16x16xf32> to vector<1x16x16xf32>
    %20 = arith.subf %16, %19 : vector<1x16x16xf32>
    %cst_9 = arith.constant dense<0xFF800000> : vector<1x16xf32>
    %21 = vector.multi_reduction <maximumf>, %20, %cst_9 [2] : vector<1x16x16xf32> to vector<1x16xf32>
    %22 = vector.shape_cast %21 : vector<1x16xf32> to vector<1x16x1xf32>
    %23 = vector.broadcast %22 : vector<1x16x1xf32> to vector<1x16x16xf32>
    %24 = arith.subf %20, %23 : vector<1x16x16xf32>
    %25 = math.exp %24 : vector<1x16x16xf32>
    %cst_10 = arith.constant dense<0.000000e+00> : vector<1x16xf32>
    %26 = vector.multi_reduction <add>, %25, %cst_10 [2] : vector<1x16x16xf32> to vector<1x16xf32>
    %27 = vector.shape_cast %26 : vector<1x16xf32> to vector<1x16x1xf32>
    %28 = vector.broadcast %27 : vector<1x16x1xf32> to vector<1x16x16xf32>
    %29 = arith.divf %25, %28 : vector<1x16x16xf32>
    %30 = vector.shape_cast %13 : vector<16x16xf32> to vector<1x16x16xf32>
    %31 = arith.addf %29, %30 : vector<1x16x16xf32>
    %32 = vector.shape_cast %31 : vector<1x16x16xf32> to vector<1x1x256xf32>
    %c0_11 = arith.constant 0 : index
    %c0_12 = arith.constant 0 : index
    %c0_13 = arith.constant 0 : index
    %33 = vector.load %arg4[%c0_11, %c0_12, %c0_13] : memref<1x1x256xf32, #tpu.memory_space<vmem>>, vector<1x1x256xf32>
    tpu.vector_store %arg4[%c0_11, %c0_12, %c0_13], %32 {strides = array<i32>} : memref<1x1x256xf32, #tpu.memory_space<vmem>>, vector<1x1x256xf32>,
    return
  }
  func.func @transform_0(%arg0: i32) -> (i32, i32, i32) {
    %c0_i32 = arith.constant 0 : i32
    %c0_i32_0 = arith.constant 0 : i32
    %c0_i32_1 = arith.constant 0 : i32
    return %arg0, %c0_i32, %c0_i32_0 : i32, i32, i32
  }
  func.func @transform_1(%arg0: i32) -> (i32, i32) {
    %c0_i32 = arith.constant 0 : i32
    %c0_i32_0 = arith.constant 0 : i32
    %c0_i32_1 = arith.constant 0 : i32
    return %c0_i32, %c0_i32_0 : i32, i32
  }
  func.func @transform_2(%arg0: i32) -> (i32, i32) {
    %c0_i32 = arith.constant 0 : i32
    %c0_i32_0 = arith.constant 0 : i32
    %c0_i32_1 = arith.constant 0 : i32
    return %c0_i32, %c0_i32_0 : i32, i32
  }
  func.func @transform_3(%arg0: i32) -> (i32, i32, i32) {
    %c0_i32 = arith.constant 0 : i32
    %c0_i32_0 = arith.constant 0 : i32
    %c0_i32_1 = arith.constant 0 : i32
    return %arg0, %c0_i32, %c0_i32_0 : i32, i32, i32
  }
}

</mosaic_0001>

<bundles_post_ra>
// kernel: tpu_custom_call.1
= control target key start
LH: loop header
LB: loop body
LE: loop exit
PB: predicated region body
PF: predicated region fallthrough
CT: control target
= control target key end

     0   :  { %8 = vsyncpa [#allocation3], 0  ;;  %s1281_s0 = inlined_call_operand.hbm [shape: f32[2,16,32], index: 0, kind: input, shape index: {}]   ;;  %s1282_s1 = inlined_call_operand.hbm [shape: f32[32,32], index: 1, kind: input, shape index: {}]   ;;  %s1283_s2 = inlined_call_operand.vmem [shape: f32[1,32], index: 2, kind: input, shape index: {}]   ;;  %s1284_s3 = inlined_call_operand.hbm [shape: f32[2,1,256], index: 3, kind: output, shape index: {}]  }
   0x1   :  { %10 = vsyncpa [#allocation3 + $0x1], 0 }
   0x2   :  { %11 = vsyncpa [#allocation6], 0 }
   0x3   :  { %12 = vsyncpa [#allocation4], 0 }
   0x4   :  { %14 = vsyncpa [#allocation4 + $0x1], 0  ;;  %s1028_s12 = smov 0   ;;  %s1030_s13 = smov 0  }
   0x5   :  { %s1032_s14 = smov 0   ;;  %s1034_s15 = smov 0  }
   0x6 LB: > { %s1049_s16 = sadd.s32 4294967295, %s990_s15   ;;  %s715_s17 = sadd.s32 4294967294, %s990_s15   ;;  %s990_s15 = sphi %s1034_s15, %s1304_s15   ;;  %s986_s14 = sphi %s1032_s14, %s1303_s14   ;;  %s982_s13 = sphi %s1030_s13, %s1302_s13   ;;  %s978_s12 = sphi %s1028_s12, %s1301_s12  }
   0x7   : > { %p40_p0 = scmp.ne.s32.totalorder %s982_s13, %s978_s12  ;;  %p1285_p1 = scmp.eq.s32.totalorder %s1049_s16, 0 }
   0x8   : > { %p112_p3 = scmp.eq.s32.totalorder %s715_s17, 1  ;;  %p716_p5 = scmp.ge.s32.totalorder %s990_s15, 1 }
   0x9   : > { %p1058_p4 = por %p1285_p1, %p40_p0  ;;  %p119_p7 = scmp.lt.s32.totalorder %s990_s15, 3 }
   0xa   : > { %p1063_p6 = por %p112_p3, %p40_p0  ;;  %s992_s21 = smov [#allocation5]  }
   0xb   : > { %s1288_s18 = scalar_select %p1058_p4, 1, 0 }
   0xc   : > { %s1289_s19 = scalar_select %p1063_p6, 1, 0 }
   0xd   : > { %p1068_p8 = pnand %p716_p5, %p119_p7  ;;  %s131_s22 = sshll.u32 %s992_s21, 4  ;;  %s1072_s22 = int_to_ptr.vmem [resolvable:$true] %s131_s22 }
   0xe   : > { %s1084_s24 = sadd.s32 1, %s990_s15   ;;  %s27_s25 = sadd.s32 1, %s986_s14 }
   0xf   : > { %s1290_s20 = scalar_select %p1068_p8, 1, 0 }
  0x10   : > { %p792_p9 = pneg %p1068_p8  ;;  %s24_s26 = ssub.s32 %s990_s15, %s1084_s24 }
  0x11   : > { %s862_s29 = scalar_lea.hbm %s1282_s1, 512 }
  0x12   : > { %p1079_p11 = pnand %p792_p9, %p1285_p1  ;;  %p863_p12 = scmp.ne.s32.totalorder %s1282_s1, %s862_s29 }
  0x13   : > { %p869_p5 = scmp.lt.u32.totalorder %s862_s29, %s1282_s1 }
  0x14   : > { %p864_p13 = pneg %p1079_p11 }
  0x16   : > { %p865_p0 = pnand %p864_p13, %p863_p12 }
  0x18   : > { %p866_p3 = pneg %p865_p0 }
  0x1a   : > { %p871_p7 = pnand %p869_p5, %p866_p3 }
  0x1c   : > { %874 = shalt.err (!%p871_p7)
}
  0x1d   : > { %s875_s7 = scalar_lea.vmem %s1072_s22, 512  ;;  %p883_p2 = scmp.lt.s32.totalorder %s1072_s22, %s1072_s22 }
  0x1e   : > { %p876_p9 = scmp.ne.s32.totalorder %s1072_s22, %s875_s7  ;;  %p884_p6 = scmp.lt.s32.totalorder %s875_s7, %s875_s7 }
  0x20   : > { %p878_p10 = pnand %p876_p9, %p864_p13  ;;  %p885_p4 = por %p884_p6, %p883_p2 }
  0x22   : > { %p879_p1 = pneg %p878_p10 }
  0x24   : > { %p886_p8 = pnand %p885_p4, %p879_p1 }
  0x26   : > { %889 = shalt.err (!%p886_p8)
}
  0x27   : > { %s993_s8 = smov 128   ;;  %s994_s9 = smov 8  }
  0x28   : > { %795 = dma.hbm_to_vmem [thread:$0]  (!%p1079_p11), %s1282_s1, 512, %s1072_s22, [#allocation6], %s993_s8, %s993_s8, %s994_s9  }
  0x29   : > { %p25_p1 = scmp.eq.s32.totalorder %s24_s26, 0  ;;  %p34_p2 = scmp.ne.s32.totalorder %s986_s14, %s982_s13 }
  0x2a   : > { %p35_p4 = scmp.eq.s32.totalorder %s990_s15, 0  ;;  %p805_p6 = scmp.lt.s32.totalorder %s990_s15, 2 }
  0x2b   : > { %s1118_s17 = scalar_select %p25_p1, %s986_s14, %s27_s25  }
  0x2c   : > { %p36_p8 = por %p35_p4, %p34_p2  ;;  %p1292_p10 = scmp.eq.s32.totalorder %s1049_s16, 1 }
  0x2d   : > { %s148_s23 = sand.u32 1, %s986_s14   ;;  %s740_s27 = sshll.u32 %s990_s15, 8 }
  0x2e   : > { %p1122_p12 = por %p1292_p10, %p34_p2  ;;  %s719_s28 = sshll.u32 %s148_s23, 4 }
  0x2f   : > { %s1131_s4 = scalar_lea.hbm %s1281_s0, %s740_s27  ;;  %s152_s22 = scalar_lea.vmem [#allocation2], %s719_s28 }
  0x30   : > { %s159_s25 = sshll.u32 %s152_s22, 4  ;;  %p1133_p11 = pnand %p805_p6, %p36_p8  ;;  %s1137_s25 = int_to_ptr.vmem [resolvable:$true] %s159_s25 }
  0x31   : > { %s1139_s5 = scalar_lea.sflag [#allocation3], %s148_s23  ;;  %s890_s6 = scalar_lea.hbm %s1131_s4, 256 }
  0x32   : > { %p891_p13 = scmp.ne.s32.totalorder %s1131_s4, %s890_s6  ;;  %p892_p0 = pneg %p1133_p11 }
  0x33   : > { %s895_s11 = scalar_lea.hbm %s1281_s0, 512  ;;  %p896_p7 = scmp.lt.u32.totalorder %s1131_s4, %s1281_s0 }
  0x34   : > { %p893_p3 = pnand %p892_p0, %p891_p13  ;;  %p897_p9 = scmp.lt.u32.totalorder %s895_s11, %s890_s6 }
  0x35   : > { %p899_p2 = scmp.lt.u32.totalorder %s890_s6, %s1131_s4 }
  0x36   : > { %p894_p5 = pneg %p893_p3  ;;  %p898_p1 = por %p897_p9, %p896_p7 }
  0x38   : > { %p900_p4 = por %p899_p2, %p898_p1 }
  0x3a   : > { %p901_p6 = pnand %p900_p4, %p894_p5 }
  0x3c   : > { %904 = shalt.err (!%p901_p6)
}
  0x3d   : > { %s905_s23 = scalar_lea.vmem %s1137_s25, 256  ;;  %s995_s29 = smov [#allocation2]  }
  0x3e   : > { %p906_p8 = scmp.ne.s32.totalorder %s1137_s25, %s905_s23  ;;  %s910_s30 = sshll.u32 %s995_s29, 4  ;;  %s911_s30 = int_to_ptr.vmem [resolvable:$false] %s910_s30 }
  0x3f   : > { %s912_s22 = scalar_lea.vmem %s911_s30, 512  ;;  %p913_p3 = scmp.lt.s32.totalorder %s1137_s25, %s911_s30 }
  0x40   : > { %p908_p10 = pnand %p906_p8, %p892_p0  ;;  %p914_p7 = scmp.lt.s32.totalorder %s912_s22, %s905_s23 }
  0x42   : > { %p909_p13 = pneg %p908_p10  ;;  %p915_p9 = por %p914_p7, %p913_p3 }
  0x44   : > { %p916_p1 = pnand %p915_p9, %p909_p13 }
  0x46   : > { %919 = shalt.err (!%p916_p1)
}
  0x47   : > { %799 = dma.hbm_to_vmem [thread:$0]  (!%p1133_p11), %s1131_s4, 256, %s1137_s25, %s1139_s5, %s993_s8, %s993_s8, %s994_s9  }
  0x48   : > { %p1295_p0 = scmp.ne.s32.totalorder %s1290_s20, 0 }
  0x49   : > { %s1173_s6 = sand.u32 (!%p1295_p0), 1, %s982_s13   ;;  %p1296_p5 = scmp.ne.s32.totalorder (!%p1295_p0), %s1288_s18, 0 }
  0x4a   : > { %171 = sbr.rel (%p1295_p0) target bundleno = 1030 (0x406), region = 32  ;;  %s723_s7 = sshll.u32 (!%p1295_p0), %s1173_s6, 4 }
  0x4b   : > { %s174_s10 = scalar_lea.sflag (!%p1295_p0), [#allocation3], %s1173_s6  ;;  %s177_s11 = scalar_lea.vmem (!%p1295_p0), [#allocation2], %s723_s7 }
  0x51   : > { %965 = dma.done.wait (%p1296_p5), %s174_s10, 256  }
  0x52   : > { %967 = vsyncadd (%p1296_p5), %s174_s10, 4294967040  ;;  %p1297_p2 = scmp.eq.s32.totalorder %s1049_s16, 0 }
  0x54   : > { %969 = dma.done.wait (%p1297_p2), [#allocation6], 512   ;;  %p1298_p11 = pmov %p1297_p2 }
  0x55   : > { %vm217_vm0 = vcmask 261120   ;;  %v206_v0 = vld [vmem:[#allocation5] sm:$0xff]  ;;  %v207_v1 = vld [vmem:[#allocation5 + $0x8] sm:$0xff]  ;;  %v208_v2 = vld [vmem:[#allocation5 + $0x10] sm:$0xff]  ;;  %v380_v14 = vlaneseq  ;;  %v996_v18 = vmov 0.0   ;;  %vm399_vm4 = vcmask 130048  }
  0x56   : > { %971 = vsyncadd (%p1298_p11), [#allocation6], 4294966784  ;;  %v770_v3 = vpack.c.bf16 %v207_v1, %v206_v0  ;;  %v209_v4 = vld [vmem:[#allocation5 + $0x18] sm:$0xff]  ;;  %v204_v5 = vld [vmem:[%s177_s11] sm:$0xff]  ;;  %v997_v45 = vmov 1983009808  }
  0x57   : > { %v774_v6 = vpack.c.bf16 %v209_v4, %v208_v2  ;;  %760 = vmatprep.mubr.msk.f32.mxu0 %vm217_vm0, %v204_v5  ;;  %v205_v7 = vld [vmem:[%s177_s11 + $0x8] sm:$0xff]  ;;  %v726_v8 = vld [vmem:[%s1283_s2] ss:$0 sm:$0xff]  ;;  %vm779_vm1 = vmpackc.low %vm217_vm0, %vm217_vm0  ;;  %v1195_v15 = vshrl.u32 %v380_v14, 7  ;;  %v384_v16 = vand.u32 127, %v380_v14  ;;  %v426_v46 = vunpack.c.l.s4 %v997_v45  ;;  %s999_s8 = smov 16  }
  0x58   : > { %771 = vmatprep.subr.bf16.mxu0 %v770_v3  ;;  %v998_v47 = vmov 1934713408   ;;  %s1000_s9 = smov 64   ;;  %s1001_s4 = smov 48   ;;  %vm580_vm5 = vcmask 392192   ;;  %vm582_vm6 = vcmask 523264  }
  0x59   : > { %773 = vmatpush3.bf16.msra.mxu0 %v770_v3  ;;  %v382_v17 = vadd.s32 8, %v1195_v15  ;;  %vm385_vm2 = vcmp.eq.s32.totalorder %v1195_v15, %v384_v16  ;;  %v441_v48 = vunpack.c.l.s4 %v998_v47  ;;  %v427_v49 = vunpack.c.0.s8 %v426_v46  ;;  %s1002_s25 = smov 32   ;;  %s1003_s26 = smov 80  }
  0x5a   : > { %775 = vmatprep.subr.bf16.mxu0 %v774_v6  ;;  %v733_v19 = vsel %vm385_vm2, 1.0, %v996_v18  ;;  %s1004_s5 = smov 96   ;;  %s1005_s27 = smov 112   ;;  %vm584_vm7 = vcmask 654336   ;;  %vm586_vm8 = vcmask 785408   ;;  %vm588_vm9 = vcmask 916480  }
  0x5b   : > { %vm386_vm3 = vcmp.eq.s32.totalorder %v382_v17, %v384_v16  ;;  %v395_v25 = vmul.f32 1e+08, %v733_v19  ;;  %v442_v50 = vunpack.c.0.s8 %v441_v48  ;;  %v430_v53 = vsub.s32 %v427_v49, %v1195_v15  ;;  %s725_s28 = sshll.u32 %s1173_s6, 1  ;;  %s741_s23 = sshll.u32 %s1049_s16, 5 }
  0x5c   : > { %v734_v23 = vsel %vm386_vm3, 1.0, %v996_v18  ;;  %s203_s29 = scalar_lea.vmem [#allocation7], %s725_s28  ;;  %vm617_vm10 = vcmp.lt.s32.totalorder %v380_v14, 256  ;;  %s1237_s10 = scalar_lea.hbm %s1284_s3, %s741_s23 }
  0x5d   : > { %777 = vmatpush3.bf16.msra.mxu0 %v774_v6  ;;  %v396_v28 = vmul.f32 1e+08, %v734_v23  ;;  %v445_v54 = vsub.s32 %v442_v50, %v1195_v15  ;;  %s635_s30 = sshll.u32 %s203_s29, 4  ;;  %s621_s11 = scalar_lea.sflag [#allocation4], %s1173_s6  ;;  %s1239_s30 = int_to_ptr.vmem [resolvable:$true] %s635_s30 }
  0x5e   : > { %s920_s18 = scalar_lea.vmem %s1239_s30, 32  ;;  %s1007_s16 = smov [#allocation7]  }
  0x5f   : > { %p921_p4 = scmp.ne.s32.totalorder %s1239_s30, %s920_s18  ;;  %s924_s20 = sshll.u32 %s1007_s16, 4  ;;  %s925_s20 = int_to_ptr.vmem [resolvable:$false] %s924_s20 }
  0x60   : > { %761 = vmatmul.mubr.msk.f32.vlgmr.msra.gmra.mrb[0].mxu0 %vm217_vm0, %v205_v7  ;;  %p927_p10 = scmp.lt.s32.totalorder %s1239_s30, %s925_s20 }
  0x61   : > { %p922_p6 = pnand %p921_p4, %p1122_p12 }
  0x63   : > { %p923_p8 = pneg %p922_p6 }
 0x133   : > { %v762_v9 = vpop.f32.mrb[0].mxu0 }
 0x134   : > { %v296_v10 = vadd.f32 %v762_v9, %v726_v8  ;;  %v290_v11 = vpop.f32.mrb[1].mxu0 }
 0x135   : > { %v291_v12 = vadd.f32 %v726_v8, %v290_v11 }
 0x137   : > { %767 = vmatprep.mubr.msk.f32.mxu1 %vm217_vm0, %v291_v12  ;;  %v778_v13 = vpack.c.bf16 %v296_v10, %v291_v12 }
 0x139   : > { %780 = vmatprep.subr.msk.bf16.mxu1 %vm779_vm1, %v778_v13 }
 0x13a   : > { %783 = vmatpush3.bf16.xpose.msk.msra.mxu1 %vm779_vm1, %v778_v13 }
 0x141   : > { %768 = vmatmul.mubr.msk.f32.vlgmr.msra.gmra.mrb[0].mxu1 %vm217_vm0, %v296_v10 }
 0x214   : > { %v769_v20 = vpop.f32.mrb[0].mxu1 }
 0x215   : > { %v392_v21 = vmul.f32 0.01, %v769_v20  ;;  %v371_v22 = vpop.f32.mrb[1].mxu1 }
 0x216   : > { %v391_v24 = vmul.f32 0.01, %v371_v22 }
 0x217   : > { %v394_v26 = vmax.f32 %v769_v20, %v392_v21 }
 0x218   : > { %v393_v27 = vmax.f32 %v371_v22, %v391_v24 }
 0x219   : > { %v398_v31 = vsub.f32 %v394_v26, %v396_v28 }
 0x21a   : > { %v397_v29 = vsub.f32 %v393_v27, %v395_v25 }
 0x21b   : > { %v403_v32 = vsel %vm399_vm4, %v398_v31, -inf }
 0x21c   : > { %v400_v30 = vsel %vm399_vm4, %v397_v29, -inf }
 0x21d   : > { %401 = vmax.xlane.f32.xlu0 %v400_v30 }
 0x221   : > { %404 = vmax.xlane.f32.xlu0 %v403_v32 }
 0x2aa   : > { %v402_v33 = vpop.xlane.xlu0 %401 }
 0x2ab   : > { %v406_v34 = vsub.f32 %v397_v29, %v402_v33 }
 0x2ad   : > { %v408_v35 = vmul.f32 1.442695, %v406_v34 }
 0x2ae   : > { %v405_v36 = vpop.xlane.xlu0 %404 }
 0x2af   : > { %854 = vpow2.f32 %v408_v35  ;;  %v407_v37 = vsub.f32 %v398_v31, %v405_v36 }
 0x2b1   : > { %v410_v38 = vmul.f32 1.442695, %v407_v37 }
 0x2b3   : > { %856 = vpow2.f32 %v410_v38  ;;  %v1006_v38 = vmov 1966171168  }
 0x2b9   : > { %v855_v39 = vpop.eup %854 }
 0x2ba   : > { %v412_v40 = vsel %vm399_vm4, %v855_v39, 0.0 }
 0x2bb   : > { %413 = vadd.xlane.f32.xlu1 %v412_v40 }
 0x2bd   : > { %v857_v41 = vpop.eup %856 }
 0x2be   : > { %v415_v42 = vsel %vm399_vm4, %v857_v41, 0.0 }
 0x2bf   : > { %416 = vadd.xlane.f32.xlu1 %v415_v42 }
 0x348   : > { %v414_v43 = vpop.xlane.xlu1 %413 }
 0x349   : > { %858 = vrcp.f32 %v414_v43 }
 0x34c   : > { %v417_v44 = vpop.xlane.xlu1 %416 }
 0x34d   : > { %860 = vrcp.f32 %v417_v44 }
 0x353   : > { %v859_v51 = vpop.eup %858 }
 0x354   : > { %v419_v52 = vmul.f32 %v859_v51, %v855_v39  ;;  %v601_v39 = vunpack.c.l.s4 %v1006_v38 }
 0x356   : > { %v422_v55 = vadd.f32 %v733_v19, %v419_v52  ;;  %v602_v45 = vunpack.c.0.s8 %v601_v39 }
 0x357   : > { %v861_v56 = vpop.eup %860 }
 0x358   : > { %v421_v57 = vmul.f32 %v861_v56, %v857_v41  ;;  %v431_v58 = vrot.slane %v422_v55, %v430_v53  ;;  %v424_v59 = vcombine.high %v422_v55, %v996_v18  ;;  %v605_v51 = vsub.s32 %v602_v45, %v1195_v15 }
 0x35a   : > { %v446_v60 = vrot.slane %v431_v58, %v445_v54  ;;  %v423_v61 = vadd.f32 %v734_v23, %v421_v57  ;;  %v438_v62 = vrot.slane %v424_v59, %v430_v53  ;;  %v439_v1 = vcombine.high %v431_v58, %v996_v18 }
 0x35c   : > { %v469_v63 = vcombine.high %v446_v60, %v996_v18  ;;  %v480_v0 = vrot.slane %v423_v61, %v430_v53  ;;  %v461_v3 = vrot.slane %v438_v62, %v445_v54  ;;  %v453_v5 = vrot.slane %v439_v1, %v445_v54 }
 0x35d   : > { %v473_v7 = vcombine.high %v423_v61, %v996_v18  ;;  %v454_v13 = vcombine.high %v438_v62, %v996_v18 }
 0x35e   : > { %523 = vrot.lane.b32.xlu0 %v469_v63, %s999_s8  ;;  %v495_v2 = vrot.slane %v480_v0, %v445_v54  ;;  %v488_v6 = vcombine.high %v480_v0, %v996_v18  ;;  %v470_v8 = vcombine.high %v453_v5, %v996_v18  ;;  %v471_v11 = vcombine.high %v461_v3, %v996_v18 }
 0x35f   : > { %v487_v10 = vrot.slane %v473_v7, %v430_v53  ;;  %v468_v16 = vrot.slane %v454_v13, %v445_v54 }
 0x360   : > { %v518_v4 = vcombine.high %v495_v2, %v996_v18  ;;  %v502_v9 = vrot.slane %v488_v6, %v445_v54 }
 0x361   : > { %v510_v12 = vrot.slane %v487_v10, %v445_v54  ;;  %v472_v17 = vcombine.high %v468_v16, %v996_v18  ;;  %v503_v21 = vcombine.high %v487_v10, %v996_v18 }
 0x362   : > { %535 = vrot.lane.b32.xlu0 %v461_v3, %s1000_s9  ;;  %551 = vrot.lane.b32.xlu1 %v518_v4, %s999_s8  ;;  %v519_v19 = vcombine.high %v502_v9, %v996_v18  ;;  %s926_s8 = scalar_lea.vmem %s925_s20, 64 }
 0x363   : > { %v520_v20 = vcombine.high %v510_v12, %v996_v18  ;;  %v517_v22 = vrot.slane %v503_v21, %v445_v54  ;;  %p928_p13 = scmp.lt.s32.totalorder %s926_s8, %s920_s18 }
 0x365   : > { %v521_v23 = vcombine.high %v517_v22, %v996_v18  ;;  %p929_p3 = por %p928_p13, %p927_p10 }
 0x366   : > { %531 = vrot.lane.b32.xlu0 %v470_v8, %s1001_s4  ;;  %555 = vrot.lane.b32.xlu1 %v502_v9, %s1002_s25 }
 0x367   : > { %p930_p7 = pnand %p929_p3, %p923_p8 }
 0x36a   : > { %539 = vrot.lane.b32.xlu0 %v471_v11, %s1003_s26  ;;  %563 = vrot.lane.b32.xlu1 %v510_v12, %s1000_s9 }
 0x36e   : > { %543 = vrot.lane.b32.xlu0 %v468_v16, %s1004_s5  ;;  %527 = vrot.lane.b32.xlu1 %v453_v5, %s1002_s25 }
 0x372   : > { %547 = vrot.lane.b32.xlu0 %v472_v17, %s1005_s27  ;;  %559 = vrot.lane.b32.xlu1 %v519_v19, %s1001_s4 }
 0x376   : > { %567 = vrot.lane.b32.xlu1 %v520_v20, %s1003_s26 }
 0x37a   : > { %571 = vrot.lane.b32.xlu1 %v517_v22, %s1004_s5 }
 0x37e   : > { %575 = vrot.lane.b32.xlu1 %v521_v23, %s1005_s27 }
 0x3d0   : > { %v524_v24 = vpop.permute.xlu0 %523 }
 0x3d1   : > { %v578_v31 = vsel %vm399_vm4, %v446_v60, %v524_v24 }
 0x3d4   : > { %v552_v25 = vpop.permute.xlu1 %551  ;;  %v536_v26 = vpop.permute.xlu0 %535 }
 0x3d5   : > { %v590_v40 = vsel %vm399_vm4, %v495_v2, %v552_v25 }
 0x3d8   : > { %v556_v27 = vpop.permute.xlu1 %555  ;;  %v532_v28 = vpop.permute.xlu0 %531 }
 0x3d9   : > { %v591_v41 = vsel %vm217_vm0, %v590_v40, %v556_v27 }
 0x3dc   : > { %v564_v29 = vpop.permute.xlu1 %563  ;;  %v540_v32 = vpop.permute.xlu0 %539 }
 0x3e0   : > { %v528_v30 = vpop.permute.xlu1 %527  ;;  %v544_v36 = vpop.permute.xlu0 %543 }
 0x3e1   : > { %v579_v33 = vsel %vm217_vm0, %v578_v31, %v528_v30 }
 0x3e2   : > { %v581_v35 = vsel %vm580_vm5, %v579_v33, %v532_v28 }
 0x3e3   : > { %v583_v18 = vsel %vm582_vm6, %v581_v35, %v536_v26 }
 0x3e4   : > { %v560_v34 = vpop.permute.xlu1 %559  ;;  %v585_v42 = vsel %vm584_vm7, %v583_v18, %v540_v32  ;;  %v548_v47 = vpop.permute.xlu0 %547 }
 0x3e5   : > { %v592_v43 = vsel %vm580_vm5, %v591_v41, %v560_v34  ;;  %v587_v46 = vsel %vm586_vm8, %v585_v42, %v544_v36 }
 0x3e6   : > { %v593_v48 = vsel %vm582_vm6, %v592_v43, %v564_v29  ;;  %v589_v53 = vsel %vm588_vm9, %v587_v46, %v548_v47 }
 0x3e8   : > { %v568_v37 = vpop.permute.xlu1 %567 }
 0x3e9   : > { %v594_v49 = vsel %vm584_vm7, %v593_v48, %v568_v37 }
 0x3ec   : > { %v572_v44 = vpop.permute.xlu1 %571 }
 0x3ed   : > { %v595_v50 = vsel %vm586_vm8, %v594_v49, %v572_v44 }
 0x3f0   : > { %v576_v52 = vpop.permute.xlu1 %575 }
 0x3f1   : > { %v596_v54 = vsel %vm588_vm9, %v595_v50, %v576_v52 }
 0x3f2   : > { %v599_v55 = vcombine.low %v589_v53, %v596_v54 }
 0x3f4   : > { %v606_v56 = vrot.slane %v599_v55, %v605_v51 }
 0x3f6   : > { %v613_v57 = vrot.slane %v606_v56, %v605_v51 }
 0x3f8   : > { %619 = vst.msk [vmem:[%s203_s29] sm:$0x3] %vm617_vm10, %v613_v57 }
 0x3f9   : > { %933 = shalt.err (!%p930_p7)
}
 0x3fa   : > { %s934_s6 = scalar_lea.hbm %s1237_s10, 32  ;;  %s938_s25 = scalar_lea.hbm %s1284_s3, 64 }
 0x3fb   : > { %p935_p9 = scmp.ne.s32.totalorder %s1237_s10, %s934_s6  ;;  %p939_p5 = scmp.lt.u32.totalorder %s1237_s10, %s1284_s3 }
 0x3fc   : > { %p940_p2 = scmp.lt.u32.totalorder %s938_s25, %s934_s6  ;;  %p942_p4 = scmp.lt.u32.totalorder %s934_s6, %s1237_s10 }
 0x3fd   : > { %p936_p1 = pnand %p935_p9, %p1122_p12 }
 0x3fe   : > { %p941_p11 = por %p940_p2, %p939_p5 }
 0x3ff   : > { %p937_p0 = pneg %p936_p1 }
 0x400   : > { %p943_p6 = por %p942_p4, %p941_p11 }
 0x402   : > { %p944_p8 = pnand %p943_p6, %p937_p0 }
 0x404   : > { %947 = shalt.err (!%p944_p8)
}
 0x405   : > { %790 = dma.vmem_to_hbm [thread:$0]  (%p1122_p12), %s1239_s30, 32, %s1237_s10, %s621_s11  }
 0x406 PF: > { %s647_s27 = sand.u32 1, %s978_s12   ;;  %p1299_p10 = scmp.ne.s32.totalorder %s1289_s19, 0 }
 0x407   : > { %p1300_p13 = scmp.ge.s32.totalorder %s990_s15, 2  ;;  %s648_s28 = scalar_lea.sflag [#allocation4], %s647_s27 }
 0x409   : > { %p801_p3 = pnand %p1300_p13, %p1299_p10 }
 0x40b   : > { %973 = dma.done.wait (!%p801_p3), %s648_s28, 32  }
 0x40c   : > { %975 = vsyncadd (!%p801_p3), %s648_s28, 4294967264  ;;  %p17_p7 = scmp.ge.s32.totalorder %s1084_s24, 4   ;;  %s1301_s12 = smov %s982_s13 }
 0x40d   : > { %s1302_s13 = smov %s986_s14  ;;  %s1303_s14 = smov %s1118_s17 }
 0x40e   : > { %s1304_s15 = smov %s1084_s24  ;;  %19 = sbr.rel (!%p17_p7) target bundleno = 6 (0x6), region = 81 }
 0x415   :  { %653 = vsyncpa [#allocation3], 1 }
 0x416   :  { %655 = vsyncpa [#allocation3 + $0x1], 1 }
 0x417   :  { %656 = vsyncpa [#allocation6], 1 }
 0x418   :  { %657 = vsyncpa [#allocation4], 1 }
 0x419   :  { %659 = vsyncpa [#allocation4 + $0x1], 1 }

</bundles_post_ra>
